<compile_context>
chip_gen: v6e
topology: v6e:2x2x1
jax: 0.10.0
libtpu: 0.0.40
codegen_flags: <defaults>
</compile_context>

<pallas_src>
import functools

import jax
import jax.numpy as jnp
from jax import lax
from jax.experimental import pallas as pl
from jax.experimental.pallas import tpu as pltpu


def _round_up(x, m):
    return (x + m - 1) // m * m


def _pick_row_tile(seq_len, cap):
    """Largest power-of-two, multiple-of-8 divisor of seq_len, capped at `cap`."""
    t = cap
    while t >= 8:
        if seq_len % t == 0:
            return t
        t //= 2
    raise ValueError("sequence length must be a multiple of 8")


def _fused_add_layernorm(x, gamma, beta, mask, inv_d, eps):
    """LayerNorm over the (possibly lane-padded) embedding axis, in f32.

    `mask` is None when D is already lane-dense (D % 128 == 0); otherwise it
    zeroes the padded lanes so mean/var use only the true D columns (padded
    input lanes are zero, so the mean needs no mask). Padded output lanes end
    up equal to beta's padded lanes (== 0) and are sliced off in the wrapper.
    """
    mean = jnp.sum(x, axis=-1, keepdims=True) * inv_d
    centered = x - mean
    if mask is not None:
        centered = centered * mask
    var = jnp.sum(centered * centered, axis=-1, keepdims=True) * inv_d
    return centered * lax.rsqrt(var + eps) * gamma + beta


# --------------------------------------------------------------------------
# Fast path: token table resident in VMEM, gather via on-chip vector loads.
# --------------------------------------------------------------------------
def _embed_resident_kernel(ids_ref, tok_ref, pos_ref, gamma_ref, beta_ref,
                           out_ref, *, eps, d_valid, seq_len, tile, chunk):
    """One (seq-tile st, batch b) block per grid step.

    ids_ref : (B*S,)   int32 SMEM (scalar prefetch) — flattened token ids
    tok_ref : (V, Dp)  f32   VMEM — full token table (constant block index)
    pos_ref : (tile,Dp) f32  VMEM — position rows for this tile
    gamma_ref/beta_ref : (1, Dp) f32 — LayerNorm affine params
    out_ref : (tile,Dp) — output tile (batch dim squeezed)
    """
    st = pl.program_id(0)
    b = pl.program_id(1)
    base = b * seq_len + st * tile
    vmax = tok_ref.shape[0] - 1
    dp = tok_ref.shape[1]

    gamma = gamma_ref[...]
    beta = beta_ref[...]
    inv_d = jnp.float32(1.0 / d_valid)
    mask = None
    if d_valid != dp:
        lane = lax.broadcasted_iota(jnp.int32, (1, dp), 1)
        mask = (lane < d_valid).astype(jnp.float32)

    n_chunks = tile // chunk

    def body(c, carry):
        r0 = pl.multiple_of(c * chunk, chunk)
        rows = []
        for i in range(chunk):
            # Clamp like jnp.take (PyTorch would raise on OOB ids).
            tok_id = jnp.clip(ids_ref[base + r0 + i], 0, vmax)
            rows.append(tok_ref[pl.ds(tok_id, 1), :])     # on-chip vector load
        x = jnp.concatenate(rows, axis=0) + pos_ref[pl.ds(r0, chunk), :]
        y = _fused_add_layernorm(x, gamma, beta, mask, inv_d, eps)
        out_ref[pl.ds(r0, chunk), :] = y.astype(out_ref.dtype)
        return carry

    lax.fori_loop(0, n_chunks, body, 0)


# --------------------------------------------------------------------------
# Fallback path: table in HBM, double-buffered per-row DMA gather with the
# per-wave compute interleaved under the in-flight DMAs.
# --------------------------------------------------------------------------
def _embed_hbm_gather_kernel(ids_ref, tok_hbm, pos_ref, gamma_ref, beta_ref,
                             out_ref, tok_buf, sem, *, eps, d_valid, seq_len,
                             tile, chunk):
    """tok_hbm: (V, Dp) f32 HBM (memory_space=ANY); tok_buf: (2, chunk, Dp) VMEM;
    sem: (2, chunk) DMA semaphores. Up to 2*chunk row copies in flight."""
    st = pl.program_id(0)
    b = pl.program_id(1)
    base = b * seq_len + st * tile
    vmax = tok_hbm.shape[0] - 1
    dp = tok_hbm.shape[1]
    n_waves = tile // chunk

    gamma = gamma_ref[...]
    beta = beta_ref[...]
    inv_d = jnp.float32(1.0 / d_valid)
    mask = None
    if d_valid != dp:
        lane = lax.broadcasted_iota(jnp.int32, (1, dp), 1)
        mask = (lane < d_valid).astype(jnp.float32)

    def start_wave(w):
        # Read ids from SMEM and kick off `chunk` row DMAs into bank (w & 1).
        # TODO(synk): optional pad-token skip (zero the VMEM row instead of a
        # DMA) omitted — it complicates the per-row semaphore bookkeeping.
        bank = w & 1
        row0 = w * chunk
        for i in range(chunk):
            tok_id = jnp.clip(ids_ref[base + row0 + i], 0, vmax)
            pltpu.make_async_copy(
                tok_hbm.at[pl.ds(tok_id, 1)],          # (1, Dp) row in HBM
                tok_buf.at[bank, pl.ds(i, 1)],         # (1, Dp) slot in VMEM
                sem.at[bank, i],
            ).start()

    def wait_wave(w):
        bank = w & 1
        for i in range(chunk):
            # Wait descriptor: source index is irrelevant for .wait(); only the
            # semaphore and the (1, Dp) byte count must match the issued copy.
            pltpu.make_async_copy(
                tok_hbm.at[pl.ds(0, 1)],
                tok_buf.at[bank, pl.ds(i, 1)],
                sem.at[bank, i],
            ).wait()

    start_wave(0)                 # prologue: wave 0 in flight before the loop

    def body(w, carry):
        # Issue the next wave (and its SMEM id reads) BEFORE waiting on the
        # current one: keeps 2*chunk copies outstanding and keeps the scalar /
        # descriptor-issue path fed (.wait() breaks sst->sld forwarding).
        @pl.when(w + 1 < n_waves)
        def _():
            start_wave(w + 1)
        wait_wave(w)

        bank = w & 1
        r0 = pl.multiple_of(w * chunk, chunk)
        x = tok_buf[bank] + pos_ref[pl.ds(r0, chunk), :]
        y = _fused_add_layernorm(x, gamma, beta, mask, inv_d, eps)
        out_ref[pl.ds(r0, chunk), :] = y.astype(out_ref.dtype)
        return carry

    lax.fori_loop(0, n_waves, body, 0)


# --------------------------------------------------------------------------
# Wrapper
# --------------------------------------------------------------------------
def embedding_forward(ids, tok_table, pos_table, gamma, beta, *, eps,
                      out_dtype=jnp.float32, force_hbm_gather=False):
    """ids: (B, S) int -> (B, S, D) in out_dtype.

    tok_table: (V, D) token table (pad_idx row zeroed by the caller);
    pos_table: (P, D) with P >= S; gamma/beta: (D,) LayerNorm params.
    TODO(synk): dropout is a no-op here (inference / eval mode).
    """
    B, S = ids.shape
    V, D = tok_table.shape
    P = pos_table.shape[0]
    assert P >= S, "max_positions must cover the sequence length"

    # Generation-specific VMEM capacity (v5e/v6e: 128 MiB, v7x: 64 MiB).
    try:
        vmem_cap = int(pltpu.get_tpu_info().vmem_capacity_bytes)
    except Exception:
        vmem_cap = 64 << 20                       # conservative default (v7x)

    # Lane-dense embedding dim: pad up to a multiple of 128 so every store is
    # an unmasked full-lane vst; padded lanes are zero and sliced off below.
    Dp = _round_up(max(D, 128), 128)

    # Rows of (B*S) handled per grid step; 128 MiB parts get a larger cap to
    # amortize the ~0.35us per-step overhead.
    tile_cap = 1024 if vmem_cap >= (96 << 20) else 512
    tile = _pick_row_tile(S, tile_cap)

    ids_flat = ids.astype(jnp.int32).reshape(B * S)
    tok = tok_table.astype(jnp.float32)
    pos = pos_table[:S].astype(jnp.float32)
    g = gamma.astype(jnp.float32).reshape(1, D)
    bt = beta.astype(jnp.float32).reshape(1, D)
    if Dp != D:
        padw = ((0, 0), (0, Dp - D))
        tok = jnp.pad(tok, padw)
        pos = jnp.pad(pos, padw)
        g = jnp.pad(g, padw)
        bt = jnp.pad(bt, padw)

    # VMEM-resident-table fast path budget (worst case: table double-buffered).
    table_vmem = 2 * _round_up(V, 8) * Dp * 4
    block_vmem = 4 * tile * Dp * 4                 # pos + out, double-buffered
    resident_ok = table_vmem + block_vmem + (4 << 20) <= (vmem_cap * 3) // 4
    use_resident = resident_ok and not force_hbm_gather

    # Grid: st outer, b inner — pos/gamma/beta block indices are constant
    # across the inner batch axis, so the pipeline never re-copies them.
    grid = (S // tile, B)
    pos_spec = pl.BlockSpec((tile, Dp), lambda st, b, ids_r: (st, 0))
    gb_spec = pl.BlockSpec((1, Dp), lambda st, b, ids_r: (0, 0))
    out_spec = pl.BlockSpec((None, tile, Dp), lambda st, b, ids_r: (b, st, 0))
    out_shape = jax.ShapeDtypeStruct((B, S, Dp), out_dtype)

    if use_resident:
        chunk = min(8, tile)                       # rows gathered per inner step
        kernel = functools.partial(
            _embed_resident_kernel, eps=eps, d_valid=D, seq_len=S,
            tile=tile, chunk=chunk)
        tok_spec = pl.BlockSpec((V, Dp), lambda st, b, ids_r: (0, 0))
        scratch = []
        vmem_limit = table_vmem + block_vmem + (2 << 20)
    else:
        chunk = min(32, tile)                      # 2*chunk row DMAs in flight
        kernel = functools.partial(
            _embed_hbm_gather_kernel, eps=eps, d_valid=D, seq_len=S,
            tile=tile, chunk=chunk)
        tok_spec = pl.BlockSpec(memory_space=pl.ANY)   # table stays in HBM
        scratch = [
            pltpu.VMEM((2, chunk, Dp), jnp.float32),   # double-buffered gather
            pltpu.SemaphoreType.DMA((2, chunk)),       # per-row completion sems
        ]
        vmem_limit = block_vmem + 2 * chunk * Dp * 4 + (4 << 20)
    vmem_limit = int(min(max(vmem_limit, 16 << 20), vmem_cap))

    out = pl.pallas_call(
        kernel,
        out_shape=out_shape,
        grid_spec=pltpu.PrefetchScalarGridSpec(
            num_scalar_prefetch=1,                 # token ids -> SMEM
            grid=grid,
            in_specs=[tok_spec, pos_spec, gb_spec, gb_spec],
            out_specs=out_spec,
            scratch_shapes=scratch,
        ),
        compiler_params=pltpu.CompilerParams(
            dimension_semantics=("parallel", "parallel"),
            vmem_limit_bytes=vmem_limit,
        ),
    )(ids_flat, tok, pos, g, bt)

    return out[..., :D] if Dp != D else out


if __name__ == "__main__":
    # Small config consistent with the module's __init__.
    n_vocab = 128
    n_embd = 32
    max_positions = 16
    pad_idx = 0
    norm_eps = 1e-5
    B, S = 2, 8

    key = jax.random.PRNGKey(0)
    k_tok, k_pos, k_ids = jax.random.split(key, 3)

    # nn.Embedding init: N(0, 1); padding_idx row zeroed (forward semantics:
    # the pad row contributes a zero embedding, then goes through LayerNorm).
    tok_table = jax.random.normal(k_tok, (n_vocab, n_embd), dtype=jnp.float32)
    tok_table = tok_table.at[pad_idx].set(0.0)
    pos_table = jax.random.normal(k_pos, (max_positions, n_embd), dtype=jnp.float32)

    # nn.LayerNorm init: weight = 1, bias = 0.
    gamma = jnp.ones((n_embd,), dtype=jnp.float32)
    beta = jnp.zeros((n_embd,), dtype=jnp.float32)

    # Token ids, including some pad tokens.
    ids = jax.random.randint(k_ids, (B, S), 0, n_vocab, dtype=jnp.int32)
    ids = ids.at[0, -2:].set(pad_idx)

    # Pure-JAX reference.
    ref_x = jnp.take(tok_table, ids, axis=0) + pos_table[:S][None, :, :]
    ref_mean = jnp.mean(ref_x, axis=-1, keepdims=True)
    ref_var = jnp.mean((ref_x - ref_mean) ** 2, axis=-1, keepdims=True)
    ref = (ref_x - ref_mean) / jnp.sqrt(ref_var + norm_eps) * gamma + beta

    # Fast path: token table resident in VMEM (selected automatically here).
    out = jax.block_until_ready(
        embedding_forward(ids, tok_table, pos_table, gamma, beta, eps=norm_eps))
    assert out.shape == (B, S, n_embd)
    assert jnp.allclose(out, ref, atol=1e-5, rtol=1e-5), "VMEM path mismatch"

    # Fallback path: table kept in HBM, double-buffered DMA row gather.
    out2 = jax.block_until_ready(
        embedding_forward(ids, tok_table, pos_table, gamma, beta, eps=norm_eps,
                          force_hbm_gather=True))
    assert jnp.allclose(out2, ref, atol=1e-5, rtol=1e-5), "HBM path mismatch"

    print("KERNEL_OK")
</pallas_src>

<mosaic_0001>
module attributes {stable_mosaic.version = 11 : i64} {
  func.func @_embed_resident_kernel(%arg0: i32, %arg1: i32, %arg2: memref<16xi32, #tpu.memory_space<smem>>, %arg3: memref<128x128xf32, #tpu.memory_space<vmem>>, %arg4: memref<8x128xf32, #tpu.memory_space<vmem>>, %arg5: memref<1x128xf32, #tpu.memory_space<vmem>>, %arg6: memref<1x128xf32, #tpu.memory_space<vmem>>, %arg7: memref<1x8x128xf32, #tpu.memory_space<vmem>>) attributes {dimension_semantics = [#tpu.dimension_semantics<parallel>, #tpu.dimension_semantics<parallel>], iteration_bounds = array<i64: 1, 2>, scalar_prefetch = 1 : i64, scratch_operands = 0 : i64, tpu.core_type = #tpu.core_type<tc>, window_params = [{pipeline_mode = #tpu.pipeline_mode<synchronous>, transform_indices = @transform_0, window_bounds = array<i64: 128, 128>}, {transform_indices = @transform_1, window_bounds = array<i64: 8, 128>}, {pipeline_mode = #tpu.pipeline_mode<synchronous>, transform_indices = @transform_2, window_bounds = array<i64: 1, 128>}, {pipeline_mode = #tpu.pipeline_mode<synchronous>, transform_indices = @transform_3, window_bounds = array<i64: 1, 128>}, {transform_indices = @transform_4, window_bounds = array<i64: 1, 8, 128>}]} {
    %c8_i32 = arith.constant 8 : i32
    %0 = arith.muli %arg1, %c8_i32 : i32
    %c8_i32_0 = arith.constant 8 : i32
    %1 = arith.muli %arg0, %c8_i32_0 : i32
    %2 = arith.addi %0, %1 : i32
    %c0 = arith.constant 0 : index
    %c0_1 = arith.constant 0 : index
    %3 = vector.load %arg5[%c0, %c0_1] : memref<1x128xf32, #tpu.memory_space<vmem>>, vector<1x128xf32>
    %c0_2 = arith.constant 0 : index
    %c0_3 = arith.constant 0 : index
    %4 = vector.load %arg6[%c0_2, %c0_3] : memref<1x128xf32, #tpu.memory_space<vmem>>, vector<1x128xf32>
    %5 = tpu.iota {dimensions = array<i32: 1>} : vector<1x128xi32>
    %c32_i32 = arith.constant 32 : i32
    %6 = vector.broadcast %c32_i32 : i32 to vector<1x128xi32>
    %7 = arith.cmpi slt, %5, %6 : vector<1x128xi32>
    %8 = arith.extui %7 : vector<1x128xi1> to vector<1x128xi32>
    %9 = arith.sitofp %8 : vector<1x128xi32> to vector<1x128xf32>
    %cst = arith.constant 3.125000e-02 : f32
    %c0_i32 = arith.constant 0 : i32
    %c8_i32_4 = arith.constant 8 : i32
    %10 = arith.muli %c0_i32, %c8_i32_4 : i32
    %11 = tpu.assume_multiple %10, 8 : i32
    %12 = arith.addi %2, %11 : i32
    %c0_i32_5 = arith.constant 0 : i32
    %13 = arith.addi %12, %c0_i32_5 : i32
    %14 = arith.index_cast %13 : i32 to index
    %15 = memref.load %arg2[%14] : memref<16xi32, #tpu.memory_space<smem>>
    %c0_i32_6 = arith.constant 0 : i32
    %c127_i32 = arith.constant 127 : i32
    %16 = arith.maxsi %c0_i32_6, %15 : i32
    %17 = arith.minsi %c127_i32, %16 : i32
    %18 = arith.index_cast %17 : i32 to index
    %c0_7 = arith.constant 0 : index
    %19 = vector.load %arg3[%18, %c0_7] : memref<128x128xf32, #tpu.memory_space<vmem>>, vector<1x128xf32>
    %20 = arith.addi %2, %11 : i32
    %c1_i32 = arith.constant 1 : i32
    %21 = arith.addi %20, %c1_i32 : i32
    %22 = arith.index_cast %21 : i32 to index
    %23 = memref.load %arg2[%22] : memref<16xi32, #tpu.memory_space<smem>>
    %c0_i32_8 = arith.constant 0 : i32
    %c127_i32_9 = arith.constant 127 : i32
    %24 = arith.maxsi %c0_i32_8, %23 : i32
    %25 = arith.minsi %c127_i32_9, %24 : i32
    %26 = arith.index_cast %25 : i32 to index
    %c0_10 = arith.constant 0 : index
    %27 = vector.load %arg3[%26, %c0_10] : memref<128x128xf32, #tpu.memory_space<vmem>>, vector<1x128xf32>
    %28 = arith.addi %2, %11 : i32
    %c2_i32 = arith.constant 2 : i32
    %29 = arith.addi %28, %c2_i32 : i32
    %30 = arith.index_cast %29 : i32 to index
    %31 = memref.load %arg2[%30] : memref<16xi32, #tpu.memory_space<smem>>
    %c0_i32_11 = arith.constant 0 : i32
    %c127_i32_12 = arith.constant 127 : i32
    %32 = arith.maxsi %c0_i32_11, %31 : i32
    %33 = arith.minsi %c127_i32_12, %32 : i32
    %34 = arith.index_cast %33 : i32 to index
    %c0_13 = arith.constant 0 : index
    %35 = vector.load %arg3[%34, %c0_13] : memref<128x128xf32, #tpu.memory_space<vmem>>, vector<1x128xf32>
    %36 = arith.addi %2, %11 : i32
    %c3_i32 = arith.constant 3 : i32
    %37 = arith.addi %36, %c3_i32 : i32
    %38 = arith.index_cast %37 : i32 to index
    %39 = memref.load %arg2[%38] : memref<16xi32, #tpu.memory_space<smem>>
    %c0_i32_14 = arith.constant 0 : i32
    %c127_i32_15 = arith.constant 127 : i32
    %40 = arith.maxsi %c0_i32_14, %39 : i32
    %41 = arith.minsi %c127_i32_15, %40 : i32
    %42 = arith.index_cast %41 : i32 to index
    %c0_16 = arith.constant 0 : index
    %43 = vector.load %arg3[%42, %c0_16] : memref<128x128xf32, #tpu.memory_space<vmem>>, vector<1x128xf32>
    %44 = arith.addi %2, %11 : i32
    %c4_i32 = arith.constant 4 : i32
    %45 = arith.addi %44, %c4_i32 : i32
    %46 = arith.index_cast %45 : i32 to index
    %47 = memref.load %arg2[%46] : memref<16xi32, #tpu.memory_space<smem>>
    %c0_i32_17 = arith.constant 0 : i32
    %c127_i32_18 = arith.constant 127 : i32
    %48 = arith.maxsi %c0_i32_17, %47 : i32
    %49 = arith.minsi %c127_i32_18, %48 : i32
    %50 = arith.index_cast %49 : i32 to index
    %c0_19 = arith.constant 0 : index
    %51 = vector.load %arg3[%50, %c0_19] : memref<128x128xf32, #tpu.memory_space<vmem>>, vector<1x128xf32>
    %52 = arith.addi %2, %11 : i32
    %c5_i32 = arith.constant 5 : i32
    %53 = arith.addi %52, %c5_i32 : i32
    %54 = arith.index_cast %53 : i32 to index
    %55 = memref.load %arg2[%54] : memref<16xi32, #tpu.memory_space<smem>>
    %c0_i32_20 = arith.constant 0 : i32
    %c127_i32_21 = arith.constant 127 : i32
    %56 = arith.maxsi %c0_i32_20, %55 : i32
    %57 = arith.minsi %c127_i32_21, %56 : i32
    %58 = arith.index_cast %57 : i32 to index
    %c0_22 = arith.constant 0 : index
    %59 = vector.load %arg3[%58, %c0_22] : memref<128x128xf32, #tpu.memory_space<vmem>>, vector<1x128xf32>
    %60 = arith.addi %2, %11 : i32
    %c6_i32 = arith.constant 6 : i32
    %61 = arith.addi %60, %c6_i32 : i32
    %62 = arith.index_cast %61 : i32 to index
    %63 = memref.load %arg2[%62] : memref<16xi32, #tpu.memory_space<smem>>
    %c0_i32_23 = arith.constant 0 : i32
    %c127_i32_24 = arith.constant 127 : i32
    %64 = arith.maxsi %c0_i32_23, %63 : i32
    %65 = arith.minsi %c127_i32_24, %64 : i32
    %66 = arith.index_cast %65 : i32 to index
    %c0_25 = arith.constant 0 : index
    %67 = vector.load %arg3[%66, %c0_25] : memref<128x128xf32, #tpu.memory_space<vmem>>, vector<1x128xf32>
    %68 = arith.addi %2, %11 : i32
    %c7_i32 = arith.constant 7 : i32
    %69 = arith.addi %68, %c7_i32 : i32
    %70 = arith.index_cast %69 : i32 to index
    %71 = memref.load %arg2[%70] : memref<16xi32, #tpu.memory_space<smem>>
    %c0_i32_26 = arith.constant 0 : i32
    %c127_i32_27 = arith.constant 127 : i32
    %72 = arith.maxsi %c0_i32_26, %71 : i32
    %73 = arith.minsi %c127_i32_27, %72 : i32
    %74 = arith.index_cast %73 : i32 to index
    %c0_28 = arith.constant 0 : index
    %75 = vector.load %arg3[%74, %c0_28] : memref<128x128xf32, #tpu.memory_space<vmem>>, vector<1x128xf32>
    %76 = tpu.concatenate %19, %27, %35, %43, %51, %59, %67, %75 in 0 : vector<1x128xf32>, vector<1x128xf32>, vector<1x128xf32>, vector<1x128xf32>, vector<1x128xf32>, vector<1x128xf32>, vector<1x128xf32>, vector<1x128xf32> -> vector<8x128xf32>
    %77 = arith.index_cast %11 : i32 to index
    %c0_29 = arith.constant 0 : index
    %78 = vector.load %arg4[%77, %c0_29] : memref<8x128xf32, #tpu.memory_space<vmem>>, vector<8x128xf32>
    %79 = arith.addf %76, %78 : vector<8x128xf32>
    %cst_30 = arith.constant dense<0.000000e+00> : vector<8xf32>
    %80 = vector.multi_reduction <add>, %79, %cst_30 [1] : vector<8x128xf32> to vector<8xf32>
    %81 = vector.shape_cast %80 : vector<8xf32> to vector<8x1xf32>
    %82 = vector.broadcast %cst : f32 to vector<8x1xf32>
    %83 = arith.mulf %81, %82 : vector<8x1xf32>
    %84 = vector.broadcast %83 : vector<8x1xf32> to vector<8x128xf32>
    %85 = arith.subf %79, %84 : vector<8x128xf32>
    %86 = vector.broadcast %9 : vector<1x128xf32> to vector<8x128xf32>
    %87 = arith.mulf %85, %86 : vector<8x128xf32>
    %88 = arith.mulf %87, %87 : vector<8x128xf32>
    %cst_31 = arith.constant dense<0.000000e+00> : vector<8xf32>
    %89 = vector.multi_reduction <add>, %88, %cst_31 [1] : vector<8x128xf32> to vector<8xf32>
    %90 = vector.shape_cast %89 : vector<8xf32> to vector<8x1xf32>
    %91 = vector.broadcast %cst : f32 to vector<8x1xf32>
    %92 = arith.mulf %90, %91 : vector<8x1xf32>
    %cst_32 = arith.constant 9.99999974E-6 : f32
    %93 = vector.broadcast %cst_32 : f32 to vector<8x1xf32>
    %94 = arith.addf %92, %93 : vector<8x1xf32>
    %95 = math.rsqrt %94 : vector<8x1xf32>
    %96 = vector.broadcast %95 : vector<8x1xf32> to vector<8x128xf32>
    %97 = arith.mulf %87, %96 : vector<8x128xf32>
    %98 = vector.broadcast %3 : vector<1x128xf32> to vector<8x128xf32>
    %99 = arith.mulf %97, %98 : vector<8x128xf32>
    %100 = vector.broadcast %4 : vector<1x128xf32> to vector<8x128xf32>
    %101 = arith.addf %99, %100 : vector<8x128xf32>
    %c0_33 = arith.constant 0 : index
    %102 = arith.index_cast %11 : i32 to index
    %c0_34 = arith.constant 0 : index
    %103 = vector.load %arg7[%c0_33, %102, %c0_34] : memref<1x8x128xf32, #tpu.memory_space<vmem>>, vector<1x8x128xf32>
    %104 = vector.shape_cast %103 : vector<1x8x128xf32> to vector<8x128xf32>
    %105 = vector.shape_cast %101 : vector<8x128xf32> to vector<1x8x128xf32>
    tpu.vector_store %arg7[%c0_33, %102, %c0_34], %105 {strides = array<i32>} : memref<1x8x128xf32, #tpu.memory_space<vmem>>, vector<1x8x128xf32>,
    %c1_i32_35 = arith.constant 1 : i32
    return
  }
  func.func @transform_0(%arg0: i32, %arg1: i32, %arg2: memref<16xi32, #tpu.memory_space<smem>>) -> (i32, i32) {
    %c0_i32 = arith.constant 0 : i32
    %c0_i32_0 = arith.constant 0 : i32
    %c0_i32_1 = arith.constant 0 : i32
    return %c0_i32, %c0_i32_0 : i32, i32
  }
  func.func @transform_1(%arg0: i32, %arg1: i32, %arg2: memref<16xi32, #tpu.memory_space<smem>>) -> (i32, i32) {
    %c0_i32 = arith.constant 0 : i32
    %c0_i32_0 = arith.constant 0 : i32
    return %arg0, %c0_i32 : i32, i32
  }
  func.func @transform_2(%arg0: i32, %arg1: i32, %arg2: memref<16xi32, #tpu.memory_space<smem>>) -> (i32, i32) {
    %c0_i32 = arith.constant 0 : i32
    %c0_i32_0 = arith.constant 0 : i32
    %c0_i32_1 = arith.constant 0 : i32
    return %c0_i32, %c0_i32_0 : i32, i32
  }
  func.func @transform_3(%arg0: i32, %arg1: i32, %arg2: memref<16xi32, #tpu.memory_space<smem>>) -> (i32, i32) {
    %c0_i32 = arith.constant 0 : i32
    %c0_i32_0 = arith.constant 0 : i32
    %c0_i32_1 = arith.constant 0 : i32
    return %c0_i32, %c0_i32_0 : i32, i32
  }
  func.func @transform_4(%arg0: i32, %arg1: i32, %arg2: memref<16xi32, #tpu.memory_space<smem>>) -> (i32, i32, i32) {
    %c0_i32 = arith.constant 0 : i32
    %c0_i32_0 = arith.constant 0 : i32
    return %arg1, %arg0, %c0_i32 : i32, i32, i32
  }
}

</mosaic_0001>

<bundles_post_ra>
// kernel: tpu_custom_call.1
= control target key start
LH: loop header
LB: loop body
LE: loop exit
PB: predicated region body
PF: predicated region fallthrough
CT: control target
= control target key end

     0   :  { %s774_s18 = smov [#allocation3]   ;;  %s981_s0 = inlined_call_operand.hbm [shape: s32[16], index: 0, kind: input, shape index: {}]   ;;  %s982_s1 = inlined_call_operand.hbm [shape: f32[128,128], index: 1, kind: input, shape index: {}]   ;;  %s983_s2 = inlined_call_operand.hbm [shape: f32[8,128], index: 2, kind: input, shape index: {}]   ;;  %s984_s3 = inlined_call_operand.vmem [shape: f32[1,128], index: 3, kind: input, shape index: {}]   ;;  %s985_s4 = inlined_call_operand.vmem [shape: f32[1,128], index: 4, kind: input, shape index: {}]   ;;  %s986_s5 = inlined_call_operand.hbm [shape: f32[2,8,128], index: 5, kind: output, shape index: {}]  }
   0x1   :  { %11 = dma.hbm_to_smem %s981_s0, 16, %s774_s18, [#allocation2] }
   0x2   :  { %736 = dma.done.wait [#allocation2], 16 }
   0x3   :  { %737 = vsyncadd [#allocation2], 4294967280 }
   0x4   :  { %13 = sfence }
   0x5   :  { %14 = vsyncpa [#allocation5], 0 }
   0x6   :  { %15 = vsyncpa [#allocation8], 0 }
   0x7   :  { %16 = vsyncpa [#allocation6], 0 }
   0x8   :  { %18 = vsyncpa [#allocation6 + $0x1], 0  ;;  %s814_s21 = smov 0   ;;  %s816_s22 = smov 0  }
   0x9   :  { %s818_s23 = smov 0   ;;  %s820_s24 = smov 0  }
   0xa   :  { %s822_s25 = smov 0   ;;  %s824_s26 = smov 0  }
   0xb LB: > { %s471_s0 = sadd.s32 4294967295, %s772_s26   ;;  %s472_s27 = sadd.s32 4294967294, %s772_s26   ;;  %s772_s26 = sphi %s824_s26, %s24_s26   ;;  %s768_s25 = sphi %s822_s25, %s999_s25   ;;  %s764_s24 = sphi %s820_s24, %s998_s24   ;;  %s760_s23 = sphi %s818_s23, %s997_s23   ;;  %s756_s22 = sphi %s816_s22, %s996_s22   ;;  %s752_s21 = sphi %s814_s21, %s995_s21  }
   0xc   : > { %s33_s28 = sadd.s32 1, %s768_s25  ;;  %s134_s29 = sadd.s32 1, %s760_s23 }
   0xd   : > { %p34_p0 = scmp.ge.s32.totalorder %s33_s28, 2  ;;  %p144_p1 = scmp.ne.s32.totalorder %s760_s23, %s756_s22 }
   0xe   : > { %p145_p2 = scmp.eq.s32.totalorder %s471_s0, 1  ;;  %p150_p3 = scmp.ne.s32.totalorder %s756_s22, %s752_s21 }
   0xf   : > { %s1001_s28 = smov (%p34_p0, %s33_s28), 0  ;;  %p151_p5 = scmp.eq.s32.totalorder %s472_s27, 1 }
  0x10   : > { %p854_p4 = por %p145_p2, %p144_p1  ;;  %s129_s6 = ssub.s32 %s768_s25, %s1001_s28 }
  0x11   : > { %p473_p6 = scmp.ge.s32.totalorder %s772_s26, 1  ;;  %p132_p7 = scmp.eq.s32.totalorder %s129_s6, 0 }
  0x12   : > { %s988_s30 = scalar_select %p854_p4, 1, 0 }
  0x13   : > { %p861_p8 = por %p151_p5, %p150_p3  ;;  %p158_p9 = scmp.lt.s32.totalorder %s772_s26, 3 }
  0x14   : > { %s867_s8 = scalar_select %p132_p7, %s760_s23, %s134_s29  }
  0x15   : > { %s989_s7 = scalar_select %p861_p8, 1, 0 }
  0x16   : > { %p869_p10 = pnand %p473_p6, %p158_p9  ;;  %p873_p11 = scmp.eq.s32.totalorder %s471_s0, 0 }
  0x17   : > { %s775_s11 = smov [#allocation4]   ;;  %s776_s14 = smov [#allocation7]  }
  0x18   : > { %p554_p12 = pneg %p869_p10  ;;  %s170_s12 = sshll.u32 %s775_s11, 4  ;;  %s171_s12 = int_to_ptr.vmem [resolvable:$true] %s170_s12 }
  0x19   : > { %s186_s15 = sshll.u32 %s776_s14, 4  ;;  %s645_s16 = scalar_lea.vmem %s171_s12, 2048  ;;  %s187_s15 = int_to_ptr.vmem [resolvable:$true] %s186_s15 }
  0x1a   : > { %p881_p13 = pnand %p873_p11, %p554_p12  ;;  %p646_p1 = scmp.ne.s32.totalorder %s171_s12, %s645_s16 }
  0x1b   : > { %p653_p5 = scmp.lt.s32.totalorder %s171_s12, %s171_s12  ;;  %p654_p6 = scmp.lt.s32.totalorder %s645_s16, %s645_s16 }
  0x1c   : > { %p636_p0 = pneg %p881_p13 }
  0x1d   : > { %p655_p7 = por %p654_p6, %p653_p5 }
  0x1e   : > { %p648_p2 = pnand %p646_p1, %p636_p0 }
  0x20   : > { %p649_p3 = pneg %p648_p2 }
  0x22   : > { %p656_p9 = pnand %p655_p7, %p649_p3 }
  0x24   : > { %659 = shalt.err (!%p656_p9)
}
  0x25   : > { %s777_s17 = smov 128   ;;  %s778_s18 = smov 8  }
  0x26   : > { %557 = dma.hbm_to_vmem [thread:$0]  (!%p881_p13), %s982_s1, 2048, %s171_s12, [#allocation5], %s777_s17, %s777_s17, %s778_s18  }
  0x27   : > { %s671_s0 = scalar_lea.vmem %s187_s15, 128  ;;  %p679_p8 = scmp.lt.s32.totalorder %s187_s15, %s187_s15 }
  0x28   : > { %p672_p12 = scmp.ne.s32.totalorder %s187_s15, %s671_s0  ;;  %p680_p4 = scmp.lt.s32.totalorder %s671_s0, %s671_s0 }
  0x2a   : > { %p674_p1 = pnand %p672_p12, %p636_p0  ;;  %p681_p5 = por %p680_p4, %p679_p8 }
  0x2c   : > { %p675_p2 = pneg %p674_p1 }
  0x2e   : > { %p682_p3 = pnand %p681_p5, %p675_p2 }
  0x30   : > { %685 = shalt.err (!%p682_p3)
}
  0x31   : > { %560 = dma.hbm_to_vmem [thread:$0]  (!%p881_p13), %s983_s2, 128, %s187_s15, [#allocation8]  }
  0x32   : > { %205 = sbr.rel (%p869_p10) target bundleno = 419 (0x1a3), region = 36 }
  0x37   : > { %739 = dma.done.wait (%p873_p11), [#allocation5], 2048  }
  0x38   : > { %741 = vsyncadd (%p873_p11), [#allocation5], 4294965248 }
  0x39   : > { %743 = dma.done.wait (%p873_p11), [#allocation8], 128  }
  0x3a   : > { %745 = vsyncadd (%p873_p11), [#allocation8], 4294967168  ;;  %s914_s6 = sshll.u32 %s764_s24, 3  ;;  %vm325_vm0 = vcmask 1040384   ;;  %vm327_vm1 = vcmask 1041408   ;;  %vm329_vm2 = vcmask 1042432   ;;  %v235_v24 = vlaneseq }
  0x3b   : > { %s241_s9 = sld [smem:[#allocation3 + %s914_s6]]  ;;  %s248_s11 = sadd.s32 1, %s914_s6  ;;  %vm331_vm3 = vcmask 1043456   ;;  %vm333_vm4 = vcmask 1044480   ;;  %vm335_vm5 = vcmask 1045504   ;;  %vm337_vm6 = vcmask 1046528  }
  0x3c   : > { %s249_s12 = sld [smem:[#allocation3 + %s248_s11]]  ;;  %s256_s13 = sadd.s32 2, %s914_s6  ;;  %v339_v21 = vld [vmem:[#allocation7] sm:$0xff]  ;;  %v236_v25 = vand.u32 127, %v235_v24  ;;  %v779_v28 = vmov 0.0  }
  0x3d   : > { %s257_s14 = sld [smem:[#allocation3 + %s256_s13]]  ;;  %s264_s15 = sadd.s32 3, %s914_s6  ;;  %v522_v37 = vld [vmem:[%s984_s3] ss:$0 sm:$0xff] }
  0x3e   : > { %s265_s16 = sld [smem:[#allocation3 + %s264_s15]]  ;;  %s272_s17 = sadd.s32 4, %s914_s6  ;;  %vm237_vm7 = vcmp.lt.s32.totalorder %v236_v25, 32  ;;  %v523_v39 = vld [vmem:[%s985_s4] ss:$0 sm:$0xff] }
  0x3f   : > { %s921_s10 = sld [smem:[#allocation3 + %s272_s17]]  ;;  %s280_s18 = sadd.s32 5, %s914_s6  ;;  %v481_v29 = vsel %vm237_vm7, 1.0, %v779_v28 }
  0x40   : > { %s924_s19 = sld [smem:[#allocation3 + %s280_s18]]  ;;  %s288_s20 = sadd.s32 6, %s914_s6 }
  0x41   : > { %p242_p4 = scmp.gt.s32.totalorder %s241_s9, 0  ;;  %p482_p8 = scmp.lt.s32.totalorder %s241_s9, 127 }
  0x42   : > { %p250_p10 = scmp.gt.s32.totalorder %s249_s12, 0  ;;  %p487_p11 = scmp.lt.s32.totalorder %s249_s12, 127 }
  0x43   : > { %s1003_s9 = smov (!%p242_p4, %s241_s9), 0  ;;  %p258_p13 = scmp.gt.s32.totalorder %s257_s14, 0 }
  0x44   : > { %s1005_s12 = smov (!%p250_p10, %s249_s12), 0  ;;  %s1007_s9 = smov (!%p482_p8, %s1003_s9), 127 }
  0x45   : > { %s1009_s12 = smov (!%p487_p11, %s1005_s12), 127  ;;  %p492_p0 = scmp.lt.s32.totalorder %s257_s14, 127 }
  0x46   : > { %s1011_s14 = smov (!%p258_p13, %s257_s14), 0  ;;  %p266_p6 = scmp.gt.s32.totalorder %s265_s16, 0 }
  0x47   : > { %p497_p7 = scmp.lt.s32.totalorder %s265_s16, 127  ;;  %s1013_s14 = smov (!%p492_p0, %s1011_s14), 127 }
  0x48   : > { %s1015_s16 = smov (!%p266_p6, %s265_s16), 0  ;;  %p274_p9 = scmp.gt.s32.totalorder %s921_s10, 0 }
  0x49   : > { %s254_s0 = scalar_lea.vmem [#allocation4], %s1009_s12  ;;  %s1017_s16 = smov (!%p497_p7, %s1015_s16), 127 }
  0x4a   : > { %v255_v0 = vld [vmem:[%s254_s0] sm:$0x1]  ;;  %s275_s27 = scalar_select %p274_p9, %s921_s10, 0 }
  0x4b   : > { %p502_p12 = scmp.lt.s32.totalorder %s921_s10, 127  ;;  %s262_s29 = scalar_lea.vmem [#allocation4], %s1013_s14  ;;  %v305_v2 = vrot.slane %v255_v0, 7 }
  0x4c   : > { %v263_v1 = vld [vmem:[%s262_s29] sm:$0x1]  ;;  %p282_p1 = scmp.gt.s32.totalorder %s924_s19, 0  ;;  %p507_p2 = scmp.lt.s32.totalorder %s924_s19, 127 }
  0x4d   : > { %s246_s11 = scalar_lea.vmem [#allocation4], %s1007_s9  ;;  %s1019_s27 = smov (!%p502_p12, %s275_s27), 127  ;;  %v308_v5 = vrot.slane %v263_v1, 6 }
  0x4e   : > { %v247_v3 = vld [vmem:[%s246_s11] sm:$0x1]  ;;  %s1021_s19 = smov (!%p282_p1, %s924_s19), 0  ;;  %s270_s13 = scalar_lea.vmem [#allocation4], %s1017_s16 }
  0x4f   : > { %v271_v4 = vld [vmem:[%s270_s13] sm:$0x1]  ;;  %s289_s12 = sld [smem:[#allocation3 + %s288_s20]]  ;;  %s1023_s19 = smov (!%p507_p2, %s1021_s19), 127  ;;  %v326_v6 = vsel %vm325_vm0, %v247_v3, %v305_v2 }
  0x50   : > { %s296_s15 = sadd.s32 7, %s914_s6  ;;  %s278_s14 = scalar_lea.vmem [#allocation4], %s1019_s27  ;;  %v311_v8 = vrot.slane %v271_v4, 5  ;;  %v328_v9 = vsel %vm327_vm1, %v326_v6, %v308_v5 }
  0x51   : > { %v279_v7 = vld [vmem:[%s278_s14] sm:$0x1]  ;;  %s297_s17 = sld [smem:[#allocation3 + %s296_s15]]  ;;  %s286_s9 = scalar_lea.vmem [#allocation4], %s1023_s19 }
  0x52   : > { %v287_v10 = vld [vmem:[%s286_s9] sm:$0x1]  ;;  %v314_v11 = vrot.slane %v279_v7, 4  ;;  %v330_v12 = vsel %vm329_vm2, %v328_v9, %v311_v8  ;;  %s227_s10 = sand.u32 1, %s756_s22   ;;  %s525_s29 = sshll.u32 %s764_s24, 7 }
  0x53   : > { %v317_v13 = vrot.slane %v287_v10, 3  ;;  %s479_s18 = sshll.u32 %s227_s10, 3  ;;  %s381_s14 = scalar_lea.hbm %s986_s5, %s525_s29 }
  0x54   : > { %v332_v14 = vsel %vm331_vm3, %v330_v12, %v314_v11  ;;  %s229_s11 = scalar_lea.vmem [#allocation9], %s479_s18  ;;  %p993_p11 = scmp.ne.s32.totalorder %s988_s30, 0 }
  0x55   : > { %p290_p5 = scmp.gt.s32.totalorder %s289_s12, 0  ;;  %p512_p3 = scmp.lt.s32.totalorder %s289_s12, 127  ;;  %v334_v16 = vsel %vm333_vm4, %v332_v14, %v317_v13 }
  0x56   : > { %s383_s13 = sshll.u32 %s229_s11, 4  ;;  %s384_s13 = int_to_ptr.vmem [resolvable:$true] %s383_s13 }
  0x57   : > { %s1025_s12 = smov (!%p290_p5, %s289_s12), 0  ;;  %p298_p4 = scmp.gt.s32.totalorder %s297_s17, 0 }
  0x58   : > { %p517_p8 = scmp.lt.s32.totalorder %s297_s17, 127  ;;  %s1027_s12 = smov (!%p512_p3, %s1025_s12), 127 }
  0x59   : > { %s1029_s17 = smov (!%p298_p4, %s297_s17), 0  ;;  %s294_s6 = scalar_lea.vmem [#allocation4], %s1027_s12 }
  0x5a   : > { %v295_v15 = vld [vmem:[%s294_s6] sm:$0x1]  ;;  %s1031_s17 = smov (!%p517_p8, %s1029_s17), 127  ;;  %s686_s9 = scalar_lea.vmem %s384_s13, 128 }
  0x5b   : > { %v320_v17 = vrot.slane %v295_v15, 2  ;;  %s302_s16 = scalar_lea.vmem [#allocation4], %s1031_s17  ;;  %s369_s17 = scalar_lea.sflag [#allocation6], %s227_s10 }
  0x5c   : > { %v303_v18 = vld [vmem:[%s302_s16] sm:$0x1]  ;;  %p687_p10 = scmp.ne.s32.totalorder %s384_s13, %s686_s9  ;;  %s780_s6 = smov [#allocation9]  }
  0x5d   : > { %v336_v19 = vsel %vm335_vm5, %v334_v16, %v320_v17  ;;  %v323_v20 = vrot.slane %v303_v18, 1  ;;  %s690_s16 = sshll.u32 %s780_s6, 4  ;;  %s691_s16 = int_to_ptr.vmem [resolvable:$false] %s690_s16 }
  0x5e   : > { %p688_p13 = pnand %p687_p10, %p993_p11  ;;  %s692_s24 = scalar_lea.vmem %s691_s16, 256 }
  0x5f   : > { %v338_v22 = vsel %vm337_vm6, %v336_v19, %v323_v20  ;;  %p693_p6 = scmp.lt.s32.totalorder %s384_s13, %s691_s16  ;;  %p694_p7 = scmp.lt.s32.totalorder %s692_s24, %s686_s9 }
  0x60   : > { %v340_v23 = vadd.f32 %v339_v21, %v338_v22  ;;  %p689_p0 = pneg %p688_p13 }
  0x61   : > { %p695_p9 = por %p694_p7, %p693_p6 }
  0x62   : > { %341 = vadd.xlane.f32.xlu0 %v340_v23 }
  0x63   : > { %p696_p12 = pnand %p695_p9, %p689_p0 }
  0xeb   : > { %v342_v26 = vpop.xlane.xlu0 %341 }
  0xec   : > { %v343_v27 = vmul.f32 0.03125, %v342_v26 }
  0xee   : > { %v344_v30 = vsub.f32 %v340_v23, %v343_v27 }
  0xf0   : > { %v345_v31 = vmul.f32 %v481_v29, %v344_v30 }
  0xf2   : > { %v346_v32 = vmul.f32 %v345_v31, %v345_v31 }
  0xf4   : > { %347 = vadd.xlane.f32.xlu0 %v346_v32 }
 0x17d   : > { %v348_v33 = vpop.xlane.xlu0 %347 }
 0x17e   : > { %v349_v34 = vmul.f32 0.03125, %v348_v33 }
 0x180   : > { %v350_v35 = vadd.f32 1e-05, %v349_v34 }
 0x182   : > { %624 = vrsqrt.f32 %v350_v35 }
 0x18f   : > { %v625_v36 = vpop.eup %624 }
 0x190   : > { %v352_v38 = vmul.f32 %v625_v36, %v345_v31 }
 0x192   : > { %v359_v40 = vmul.f32 %v522_v37, %v352_v38 }
 0x194   : > { %v366_v41 = vadd.f32 %v523_v39, %v359_v40 }
 0x196   : > { %367 = vst [vmem:[%s229_s11] sm:$0xff] %v366_v41 }
 0x197   : > { %699 = shalt.err (!%p696_p12)
}
 0x198   : > { %s700_s18 = scalar_lea.hbm %s381_s14, 128  ;;  %s704_s20 = scalar_lea.hbm %s986_s5, 256 }
 0x199   : > { %p701_p1 = scmp.ne.s32.totalorder %s381_s14, %s700_s18  ;;  %p705_p3 = scmp.lt.s32.totalorder %s381_s14, %s986_s5 }
 0x19a   : > { %p706_p4 = scmp.lt.s32.totalorder %s704_s20, %s700_s18 }
 0x19b   : > { %p702_p2 = pnand %p701_p1, %p993_p11 }
 0x19c   : > { %p707_p8 = por %p706_p4, %p705_p3 }
 0x19d   : > { %p703_p5 = pneg %p702_p2 }
 0x19f   : > { %p708_p10 = pnand %p707_p8, %p703_p5 }
 0x1a1   : > { %711 = shalt.err (!%p708_p10)
}
 0x1a2   : > { %552 = dma.vmem_to_hbm [thread:$0]  (%p993_p11), %s384_s13, 128, %s381_s14, %s369_s17  }
 0x1a3 PF: > { %p569_p13 = scmp.ge.s32.totalorder %s772_s26, 2  ;;  %s395_s29 = sand.u32 1, %s752_s21  }
 0x1a4   : > { %p994_p0 = scmp.ne.s32.totalorder %s989_s7, 0  ;;  %s396_s11 = scalar_lea.sflag [#allocation6], %s395_s29 }
 0x1a6   : > { %p562_p6 = pnand %p569_p13, %p994_p0 }
 0x1a8   : > { %p563_p7 = pneg %p562_p6 }
 0x1aa   : > { %747 = dma.done.wait (%p563_p7), %s396_s11, 128  }
 0x1ab   : > { %749 = vsyncadd (%p563_p7), %s396_s11, 4294967168  ;;  %s24_s26 = sadd.s32 1, %s772_s26   ;;  %s995_s21 = smov %s756_s22 }
 0x1ac   : > { %p21_p9 = scmp.ge.s32.totalorder %s24_s26, 4   ;;  %s996_s22 = smov %s760_s23 }
 0x1ad   : > { %s997_s23 = smov %s867_s8  ;;  %s998_s24 = smov %s768_s25 }
 0x1ae   : > { %s999_s25 = smov %s1001_s28  ;;  %23 = sbr.rel (!%p21_p9) target bundleno = 11 (0xb), region = 86 }
 0x1b3   :  { %401 = vsyncpa [#allocation5], 1 }
 0x1b4   :  { %403 = vsyncpa [#allocation5 + $0x1], 1 }
 0x1b5   :  { %404 = vsyncpa [#allocation8], 1 }
 0x1b6   :  { %405 = vsyncpa [#allocation6], 1 }
 0x1b7   :  { %407 = vsyncpa [#allocation6 + $0x1], 1 }

</bundles_post_ra>
